<compile_context>
chip_gen: v5e
topology: v5e:2x2
jax: 0.10.0
libtpu: 0.0.40
codegen_flags: <defaults>
</compile_context>

<pallas_src>
import jax
import jax.numpy as jnp
from jax.experimental import pallas as pl
from jax.experimental.pallas import tpu as pltpu


def _banded_weight(w_hwio, W):
    """Fold the 3 horizontal taps (and the width zero-padding) into a banded matrix.

    w_hwio: (3, 3, Cin, Cout) conv weights (HWIO).
    Returns (3, W*Cin, W*Cout) such that, for a row-shifted image band flattened to
    (H, W*Cin), `band @ result[dy]` contributes the dy-th kernel row of the 'same'
    3x3 convolution, with left/right boundary taps already zeroed.
    """
    KH, KW, Cin, Cout = w_hwio.shape
    xw = jnp.arange(W)[:, None]       # input column index
    wo = jnp.arange(W)[None, :]       # output column index
    kw = xw - wo + 1                  # horizontal tap index, (W, W)
    valid = (kw >= 0) & (kw < KW)
    kw_c = jnp.clip(kw, 0, KW - 1)
    sel = w_hwio[:, kw_c, :, :]                         # (KH, W, W, Cin, Cout)
    sel = jnp.where(valid[None, :, :, None, None], sel, jnp.zeros_like(sel))
    big = jnp.transpose(sel, (0, 1, 3, 2, 4))           # (KH, W, Cin, W, Cout)
    return big.reshape(KH, W * Cin, W * Cout)


def double_convolution_nhwc(x_nhwc, params):
    """Fused (conv3x3 + ReLU) x 2 for NHWC input. Returns NHWC output."""
    w1, b1, w2, b2 = params           # PyTorch layout: OIHW weights, (Cout,) biases
    N, H, W, Cin = x_nhwc.shape
    Cout = w1.shape[0]

    # OIHW -> HWIO, then fold horizontal taps + width padding into banded matrices.
    w1_hwio = jnp.transpose(w1, (2, 3, 1, 0))
    w2_hwio = jnp.transpose(w2, (2, 3, 1, 0))
    bw1 = _banded_weight(w1_hwio, W).astype(jnp.bfloat16)   # (3, W*Cin,  W*Cout)
    bw2 = _banded_weight(w2_hwio, W).astype(jnp.bfloat16)   # (3, W*Cout, W*Cout)
    b1t = jnp.tile(b1, W).reshape(1, W * Cout).astype(jnp.float32)
    b2t = jnp.tile(b2, W).reshape(1, W * Cout).astype(jnp.float32)

    # Channels on the fast (lane) axis, flattened with width: (N, H, W*C).
    x2d = x_nhwc.reshape(N, H, W * Cin)

    def kernel(x_ref, w1_ref, b1_ref, w2_ref, b2_ref, o_ref, xpad_ref, mid_ref):
        # Row halo handled in VMEM: zero the scratches, drop the image into rows 1..H.
        xpad_ref[...] = jnp.zeros_like(xpad_ref)
        mid_ref[...] = jnp.zeros_like(mid_ref)
        xpad_ref[1:H + 1, :] = x_ref[0]

        def conv_relu(pad_ref, w_ref, b_ref):
            acc = b_ref[...].astype(jnp.float32)             # (1, W*Cout), broadcasts
            for dy in range(3):                              # 3 MXU matmuls, K = W*C
                band = pad_ref[dy:dy + H, :].astype(jnp.bfloat16)
                acc = acc + jnp.dot(band, w_ref[dy],
                                    preferred_element_type=jnp.float32)
            return jnp.maximum(acc, 0.0)                     # (H, W*Cout), f32

        a1 = conv_relu(xpad_ref, w1_ref, b1_ref)             # stage 1
        mid_ref[1:H + 1, :] = a1                             # intermediate stays in VMEM
        a2 = conv_relu(mid_ref, w2_ref, b2_ref)              # stage 2
        o_ref[0] = a2.astype(o_ref.dtype)                    # lane-dense (W*Cout) store

    out2d = pl.pallas_call(
        kernel,
        out_shape=jax.ShapeDtypeStruct((N, H, W * Cout), x_nhwc.dtype),
        grid_spec=pltpu.PrefetchScalarGridSpec(
            num_scalar_prefetch=0,
            grid=(N,),
            in_specs=[
                pl.BlockSpec((1, H, W * Cin), lambda n: (n, 0, 0)),
                pl.BlockSpec((3, W * Cin, W * Cout), lambda n: (0, 0, 0)),
                pl.BlockSpec((1, W * Cout), lambda n: (0, 0)),
                pl.BlockSpec((3, W * Cout, W * Cout), lambda n: (0, 0, 0)),
                pl.BlockSpec((1, W * Cout), lambda n: (0, 0)),
            ],
            out_specs=pl.BlockSpec((1, H, W * Cout), lambda n: (n, 0, 0)),
            scratch_shapes=[
                pltpu.VMEM((H + 2, W * Cin), jnp.float32),   # row-padded input
                pltpu.VMEM((H + 2, W * Cout), jnp.float32),  # row-padded intermediate
            ],
        ),
        compiler_params=pltpu.CompilerParams(
            dimension_semantics=("parallel",),
            vmem_limit_bytes=32 * 1024 * 1024,
        ),
    )(x2d, bw1, b1t, bw2, b2t)

    return out2d.reshape(N, H, W, Cout)


def double_convolution(x_nchw, params):
    """Forward pass matching PyTorch DoubleConvolution (NCHW in / NCHW out)."""
    x_nhwc = jnp.transpose(x_nchw, (0, 2, 3, 1))
    y_nhwc = double_convolution_nhwc(x_nhwc, params)
    return jnp.transpose(y_nhwc, (0, 3, 1, 2))


def init_params(key, channels_in, channels_out):
    """Deterministic init mimicking nn.Conv2d default (uniform in +/- 1/sqrt(fan_in))."""
    k1, k2, k3, k4 = jax.random.split(key, 4)
    fan1 = channels_in * 9
    fan2 = channels_out * 9
    lim1 = 1.0 / jnp.sqrt(fan1)
    lim2 = 1.0 / jnp.sqrt(fan2)
    w1 = jax.random.uniform(k1, (channels_out, channels_in, 3, 3),
                            jnp.float32, -lim1, lim1)
    b1 = jax.random.uniform(k2, (channels_out,), jnp.float32, -lim1, lim1)
    w2 = jax.random.uniform(k3, (channels_out, channels_out, 3, 3),
                            jnp.float32, -lim2, lim2)
    b2 = jax.random.uniform(k4, (channels_out,), jnp.float32, -lim2, lim2)
    return (w1, b1, w2, b2)


def _reference(x_nchw, params):
    """Pure-JAX reference (lax conv, NCHW/OIHW, f32) for correctness check."""
    w1, b1, w2, b2 = params

    def conv(x, w, b):
        y = jax.lax.conv_general_dilated(
            x, w, window_strides=(1, 1), padding=((1, 1), (1, 1)),
            dimension_numbers=("NCHW", "OIHW", "NCHW"))
        return jnp.maximum(y + b[None, :, None, None], 0.0)

    return conv(conv(x_nchw, w1, b1), w2, b2)


if __name__ == "__main__":
    key = jax.random.PRNGKey(0)
    kx, kp = jax.random.split(key)

    N, C_IN, C_OUT, H, W = 2, 4, 8, 16, 16
    x = jax.random.normal(kx, (N, C_IN, H, W), jnp.float32)
    params = init_params(kp, C_IN, C_OUT)

    out = jax.block_until_ready(double_convolution(x, params))

    ref = _reference(x, params)
    assert out.shape == (N, C_OUT, H, W)
    max_err = float(jnp.max(jnp.abs(out - ref)))
    # bf16 MXU operands with f32 accumulation -> loosened tolerance vs pure f32.
    assert jnp.allclose(out, ref, atol=5e-2, rtol=5e-2), f"max abs err {max_err}"

    print("KERNEL_OK")
</pallas_src>

<mosaic_0001>
module attributes {stable_mosaic.version = 11 : i64} {
  func.func @kernel(%arg0: i32, %arg1: memref<1x16x64xf32, #tpu.memory_space<vmem>>, %arg2: memref<3x64x128xbf16, #tpu.memory_space<vmem>>, %arg3: memref<1x128xf32, #tpu.memory_space<vmem>>, %arg4: memref<3x128x128xbf16, #tpu.memory_space<vmem>>, %arg5: memref<1x128xf32, #tpu.memory_space<vmem>>, %arg6: memref<1x16x128xf32, #tpu.memory_space<vmem>>, %arg7: memref<18x64xf32, #tpu.memory_space<vmem>>, %arg8: memref<18x128xf32, #tpu.memory_space<vmem>>) attributes {dimension_semantics = [#tpu.dimension_semantics<parallel>], iteration_bounds = array<i64: 2>, scalar_prefetch = 0 : i64, scratch_operands = 2 : i64, tpu.core_type = #tpu.core_type<tc>, window_params = [{transform_indices = @transform_0, window_bounds = array<i64: 1, 16, 64>}, {pipeline_mode = #tpu.pipeline_mode<synchronous>, transform_indices = @transform_1, window_bounds = array<i64: 3, 64, 128>}, {pipeline_mode = #tpu.pipeline_mode<synchronous>, transform_indices = @transform_2, window_bounds = array<i64: 1, 128>}, {pipeline_mode = #tpu.pipeline_mode<synchronous>, transform_indices = @transform_3, window_bounds = array<i64: 3, 128, 128>}, {pipeline_mode = #tpu.pipeline_mode<synchronous>, transform_indices = @transform_4, window_bounds = array<i64: 1, 128>}, {transform_indices = @transform_5, window_bounds = array<i64: 1, 16, 128>}]} {
    %cst = arith.constant 0.000000e+00 : f32
    %0 = vector.broadcast %cst : f32 to vector<18x64xf32>
    %c0 = arith.constant 0 : index
    %c0_0 = arith.constant 0 : index
    %1 = vector.load %arg7[%c0, %c0_0] : memref<18x64xf32, #tpu.memory_space<vmem>>, vector<18x64xf32>
    tpu.vector_store %arg7[%c0, %c0_0], %0 {strides = array<i32>} : memref<18x64xf32, #tpu.memory_space<vmem>>, vector<18x64xf32>,
    %cst_1 = arith.constant 0.000000e+00 : f32
    %2 = vector.broadcast %cst_1 : f32 to vector<18x128xf32>
    %c0_2 = arith.constant 0 : index
    %c0_3 = arith.constant 0 : index
    %3 = vector.load %arg8[%c0_2, %c0_3] : memref<18x128xf32, #tpu.memory_space<vmem>>, vector<18x128xf32>
    tpu.vector_store %arg8[%c0_2, %c0_3], %2 {strides = array<i32>} : memref<18x128xf32, #tpu.memory_space<vmem>>, vector<18x128xf32>,
    %c0_4 = arith.constant 0 : index
    %c0_5 = arith.constant 0 : index
    %c0_6 = arith.constant 0 : index
    %4 = vector.load %arg1[%c0_4, %c0_5, %c0_6] : memref<1x16x64xf32, #tpu.memory_space<vmem>>, vector<1x16x64xf32>
    %5 = vector.shape_cast %4 : vector<1x16x64xf32> to vector<16x64xf32>
    %c1 = arith.constant 1 : index
    %c0_7 = arith.constant 0 : index
    %6 = vector.load %arg7[%c1, %c0_7] : memref<18x64xf32, #tpu.memory_space<vmem>>, vector<16x64xf32>
    tpu.vector_store %arg7[%c1, %c0_7], %5 {strides = array<i32>} : memref<18x64xf32, #tpu.memory_space<vmem>>, vector<16x64xf32>,
    %c0_8 = arith.constant 0 : index
    %c0_9 = arith.constant 0 : index
    %7 = vector.load %arg3[%c0_8, %c0_9] : memref<1x128xf32, #tpu.memory_space<vmem>>, vector<1x128xf32>
    %c0_10 = arith.constant 0 : index
    %c0_11 = arith.constant 0 : index
    %8 = vector.load %arg7[%c0_10, %c0_11] : memref<18x64xf32, #tpu.memory_space<vmem>>, vector<16x64xf32>
    %9 = arith.truncf %8 : vector<16x64xf32> to vector<16x64xbf16>
    %c0_12 = arith.constant 0 : index
    %c0_13 = arith.constant 0 : index
    %c0_14 = arith.constant 0 : index
    %10 = vector.load %arg2[%c0_12, %c0_13, %c0_14] : memref<3x64x128xbf16, #tpu.memory_space<vmem>>, vector<1x64x128xbf16>
    %11 = vector.shape_cast %10 : vector<1x64x128xbf16> to vector<64x128xbf16>
    %cst_15 = arith.constant dense<0.000000e+00> : vector<16x128xf32>
    %12 = tpu.matmul %9, %11, %cst_15 {dimension_numbers = #tpu.dot_dimension_numbers<[1], [0], [0], [1], [0, 0, 1, 1], [], []>} : vector<16x64xbf16>, vector<64x128xbf16>, vector<16x128xf32> -> vector<16x128xf32>
    %13 = vector.broadcast %7 : vector<1x128xf32> to vector<16x128xf32>
    %14 = arith.addf %13, %12 : vector<16x128xf32>
    %c1_16 = arith.constant 1 : index
    %c0_17 = arith.constant 0 : index
    %15 = vector.load %arg7[%c1_16, %c0_17] : memref<18x64xf32, #tpu.memory_space<vmem>>, vector<16x64xf32>
    %16 = arith.truncf %15 : vector<16x64xf32> to vector<16x64xbf16>
    %c1_18 = arith.constant 1 : index
    %c0_19 = arith.constant 0 : index
    %c0_20 = arith.constant 0 : index
    %17 = vector.load %arg2[%c1_18, %c0_19, %c0_20] : memref<3x64x128xbf16, #tpu.memory_space<vmem>>, vector<1x64x128xbf16>
    %18 = vector.shape_cast %17 : vector<1x64x128xbf16> to vector<64x128xbf16>
    %cst_21 = arith.constant dense<0.000000e+00> : vector<16x128xf32>
    %19 = tpu.matmul %16, %18, %cst_21 {dimension_numbers = #tpu.dot_dimension_numbers<[1], [0], [0], [1], [0, 0, 1, 1], [], []>} : vector<16x64xbf16>, vector<64x128xbf16>, vector<16x128xf32> -> vector<16x128xf32>
    %20 = arith.addf %14, %19 : vector<16x128xf32>
    %c2 = arith.constant 2 : index
    %c0_22 = arith.constant 0 : index
    %21 = vector.load %arg7[%c2, %c0_22] : memref<18x64xf32, #tpu.memory_space<vmem>>, vector<16x64xf32>
    %22 = arith.truncf %21 : vector<16x64xf32> to vector<16x64xbf16>
    %c2_23 = arith.constant 2 : index
    %c0_24 = arith.constant 0 : index
    %c0_25 = arith.constant 0 : index
    %23 = vector.load %arg2[%c2_23, %c0_24, %c0_25] : memref<3x64x128xbf16, #tpu.memory_space<vmem>>, vector<1x64x128xbf16>
    %24 = vector.shape_cast %23 : vector<1x64x128xbf16> to vector<64x128xbf16>
    %cst_26 = arith.constant dense<0.000000e+00> : vector<16x128xf32>
    %25 = tpu.matmul %22, %24, %cst_26 {dimension_numbers = #tpu.dot_dimension_numbers<[1], [0], [0], [1], [0, 0, 1, 1], [], []>} : vector<16x64xbf16>, vector<64x128xbf16>, vector<16x128xf32> -> vector<16x128xf32>
    %26 = arith.addf %20, %25 : vector<16x128xf32>
    %cst_27 = arith.constant 0.000000e+00 : f32
    %27 = vector.broadcast %cst_27 : f32 to vector<16x128xf32>
    %28 = arith.maximumf %26, %27 : vector<16x128xf32>
    %c1_28 = arith.constant 1 : index
    %c0_29 = arith.constant 0 : index
    %29 = vector.load %arg8[%c1_28, %c0_29] : memref<18x128xf32, #tpu.memory_space<vmem>>, vector<16x128xf32>
    tpu.vector_store %arg8[%c1_28, %c0_29], %28 {strides = array<i32>} : memref<18x128xf32, #tpu.memory_space<vmem>>, vector<16x128xf32>,
    %c0_30 = arith.constant 0 : index
    %c0_31 = arith.constant 0 : index
    %30 = vector.load %arg5[%c0_30, %c0_31] : memref<1x128xf32, #tpu.memory_space<vmem>>, vector<1x128xf32>
    %c0_32 = arith.constant 0 : index
    %c0_33 = arith.constant 0 : index
    %31 = vector.load %arg8[%c0_32, %c0_33] : memref<18x128xf32, #tpu.memory_space<vmem>>, vector<16x128xf32>
    %32 = arith.truncf %31 : vector<16x128xf32> to vector<16x128xbf16>
    %c0_34 = arith.constant 0 : index
    %c0_35 = arith.constant 0 : index
    %c0_36 = arith.constant 0 : index
    %33 = vector.load %arg4[%c0_34, %c0_35, %c0_36] : memref<3x128x128xbf16, #tpu.memory_space<vmem>>, vector<1x128x128xbf16>
    %34 = vector.shape_cast %33 : vector<1x128x128xbf16> to vector<128x128xbf16>
    %cst_37 = arith.constant dense<0.000000e+00> : vector<16x128xf32>
    %35 = tpu.matmul %32, %34, %cst_37 {dimension_numbers = #tpu.dot_dimension_numbers<[1], [0], [0], [1], [0, 0, 1, 1], [], []>} : vector<16x128xbf16>, vector<128x128xbf16>, vector<16x128xf32> -> vector<16x128xf32>
    %36 = vector.broadcast %30 : vector<1x128xf32> to vector<16x128xf32>
    %37 = arith.addf %36, %35 : vector<16x128xf32>
    %c1_38 = arith.constant 1 : index
    %c0_39 = arith.constant 0 : index
    %38 = vector.load %arg8[%c1_38, %c0_39] : memref<18x128xf32, #tpu.memory_space<vmem>>, vector<16x128xf32>
    %39 = arith.truncf %38 : vector<16x128xf32> to vector<16x128xbf16>
    %c1_40 = arith.constant 1 : index
    %c0_41 = arith.constant 0 : index
    %c0_42 = arith.constant 0 : index
    %40 = vector.load %arg4[%c1_40, %c0_41, %c0_42] : memref<3x128x128xbf16, #tpu.memory_space<vmem>>, vector<1x128x128xbf16>
    %41 = vector.shape_cast %40 : vector<1x128x128xbf16> to vector<128x128xbf16>
    %cst_43 = arith.constant dense<0.000000e+00> : vector<16x128xf32>
    %42 = tpu.matmul %39, %41, %cst_43 {dimension_numbers = #tpu.dot_dimension_numbers<[1], [0], [0], [1], [0, 0, 1, 1], [], []>} : vector<16x128xbf16>, vector<128x128xbf16>, vector<16x128xf32> -> vector<16x128xf32>
    %43 = arith.addf %37, %42 : vector<16x128xf32>
    %c2_44 = arith.constant 2 : index
    %c0_45 = arith.constant 0 : index
    %44 = vector.load %arg8[%c2_44, %c0_45] : memref<18x128xf32, #tpu.memory_space<vmem>>, vector<16x128xf32>
    %45 = arith.truncf %44 : vector<16x128xf32> to vector<16x128xbf16>
    %c2_46 = arith.constant 2 : index
    %c0_47 = arith.constant 0 : index
    %c0_48 = arith.constant 0 : index
    %46 = vector.load %arg4[%c2_46, %c0_47, %c0_48] : memref<3x128x128xbf16, #tpu.memory_space<vmem>>, vector<1x128x128xbf16>
    %47 = vector.shape_cast %46 : vector<1x128x128xbf16> to vector<128x128xbf16>
    %cst_49 = arith.constant dense<0.000000e+00> : vector<16x128xf32>
    %48 = tpu.matmul %45, %47, %cst_49 {dimension_numbers = #tpu.dot_dimension_numbers<[1], [0], [0], [1], [0, 0, 1, 1], [], []>} : vector<16x128xbf16>, vector<128x128xbf16>, vector<16x128xf32> -> vector<16x128xf32>
    %49 = arith.addf %43, %48 : vector<16x128xf32>
    %cst_50 = arith.constant 0.000000e+00 : f32
    %50 = vector.broadcast %cst_50 : f32 to vector<16x128xf32>
    %51 = arith.maximumf %49, %50 : vector<16x128xf32>
    %c0_51 = arith.constant 0 : index
    %c0_52 = arith.constant 0 : index
    %c0_53 = arith.constant 0 : index
    %52 = vector.load %arg6[%c0_51, %c0_52, %c0_53] : memref<1x16x128xf32, #tpu.memory_space<vmem>>, vector<1x16x128xf32>
    %53 = vector.shape_cast %52 : vector<1x16x128xf32> to vector<16x128xf32>
    %54 = vector.shape_cast %51 : vector<16x128xf32> to vector<1x16x128xf32>
    tpu.vector_store %arg6[%c0_51, %c0_52, %c0_53], %54 {strides = array<i32>} : memref<1x16x128xf32, #tpu.memory_space<vmem>>, vector<1x16x128xf32>,
    return
  }
  func.func @transform_0(%arg0: i32) -> (i32, i32, i32) {
    %c0_i32 = arith.constant 0 : i32
    %c0_i32_0 = arith.constant 0 : i32
    %c0_i32_1 = arith.constant 0 : i32
    return %arg0, %c0_i32, %c0_i32_0 : i32, i32, i32
  }
  func.func @transform_1(%arg0: i32) -> (i32, i32, i32) {
    %c0_i32 = arith.constant 0 : i32
    %c0_i32_0 = arith.constant 0 : i32
    %c0_i32_1 = arith.constant 0 : i32
    %c0_i32_2 = arith.constant 0 : i32
    return %c0_i32, %c0_i32_0, %c0_i32_1 : i32, i32, i32
  }
  func.func @transform_2(%arg0: i32) -> (i32, i32) {
    %c0_i32 = arith.constant 0 : i32
    %c0_i32_0 = arith.constant 0 : i32
    %c0_i32_1 = arith.constant 0 : i32
    return %c0_i32, %c0_i32_0 : i32, i32
  }
  func.func @transform_3(%arg0: i32) -> (i32, i32, i32) {
    %c0_i32 = arith.constant 0 : i32
    %c0_i32_0 = arith.constant 0 : i32
    %c0_i32_1 = arith.constant 0 : i32
    %c0_i32_2 = arith.constant 0 : i32
    return %c0_i32, %c0_i32_0, %c0_i32_1 : i32, i32, i32
  }
  func.func @transform_4(%arg0: i32) -> (i32, i32) {
    %c0_i32 = arith.constant 0 : i32
    %c0_i32_0 = arith.constant 0 : i32
    %c0_i32_1 = arith.constant 0 : i32
    return %c0_i32, %c0_i32_0 : i32, i32
  }
  func.func @transform_5(%arg0: i32) -> (i32, i32, i32) {
    %c0_i32 = arith.constant 0 : i32
    %c0_i32_0 = arith.constant 0 : i32
    %c0_i32_1 = arith.constant 0 : i32
    return %arg0, %c0_i32, %c0_i32_0 : i32, i32, i32
  }
}

</mosaic_0001>

<bundles_post_ra>
// kernel: tpu_custom_call.1
= control target key start
LH: loop header
LB: loop body
LE: loop exit
PB: predicated region body
PF: predicated region fallthrough
CT: control target
= control target key end

     0   :  { %10 = vsyncpa [#allocation5], 0  ;;  %s1468_s0 = inlined_call_operand.hbm [shape: f32[2,16,64], index: 0, kind: input, shape index: {}]   ;;  %s1469_s1 = inlined_call_operand.hbm [shape: bf16[3,64,128], index: 1, kind: input, shape index: {}]   ;;  %s1470_s2 = inlined_call_operand.vmem [shape: f32[1,128], index: 2, kind: input, shape index: {}]   ;;  %s1471_s3 = inlined_call_operand.hbm [shape: bf16[3,128,128], index: 3, kind: input, shape index: {}]   ;;  %s1472_s4 = inlined_call_operand.vmem [shape: f32[1,128], index: 4, kind: input, shape index: {}]   ;;  %s1473_s5 = inlined_call_operand.hbm [shape: f32[2,16,128], index: 5, kind: output, shape index: {}]  }
   0x1   :  { %12 = vsyncpa [#allocation5 + $0x1], 0 }
   0x2   :  { %13 = vsyncpa [#allocation8], 0 }
   0x3   :  { %14 = vsyncpa [#allocation6], 0 }
   0x4   :  { %16 = vsyncpa [#allocation6 + $0x1], 0  ;;  %s1310_s18 = smov 0   ;;  %s1312_s19 = smov 0  }
   0x5   :  { %s1314_s20 = smov 0   ;;  %s1316_s21 = smov 0  }
   0x6 LB: > { %s1331_s22 = sadd.s32 4294967295, %s1269_s21   ;;  %s830_s23 = sadd.s32 4294967294, %s1269_s21   ;;  %s1269_s21 = sphi %s1316_s21, %s1483_s21   ;;  %s1265_s20 = sphi %s1314_s20, %s1482_s20   ;;  %s1261_s19 = sphi %s1312_s19, %s1481_s19   ;;  %s1257_s18 = sphi %s1310_s18, %s1480_s18  }
   0x7   : > { %p42_p0 = scmp.ne.s32.totalorder %s1261_s19, %s1257_s18  ;;  %p43_p1 = scmp.eq.s32.totalorder %s1331_s22, 0 }
   0x8   : > { %p150_p2 = scmp.eq.s32.totalorder %s1331_s22, 1  ;;  %p156_p3 = scmp.eq.s32.totalorder %s830_s23, 1 }
   0x9   : > { %p1340_p4 = por %p43_p1, %p42_p0  ;;  %p831_p5 = scmp.ge.s32.totalorder %s1269_s21, 1 }
   0xa   : > { %p1345_p6 = por %p156_p3, %p42_p0  ;;  %p163_p7 = scmp.lt.s32.totalorder %s1269_s21, 3 }
   0xb   : > { %s174_s28 = sshll.u32 %s1469_s1, 4  ;;  %s1271_s30 = smov [#allocation7]   ;;  %s175_s28 = int_to_ptr.hbm [resolvable:$true] %s174_s28 }
   0xc   : > { %p1353_p8 = pnand %p831_p5, %p163_p7  ;;  %s176_s6 = sshll.u32 %s1271_s30, 4  ;;  %s177_s6 = int_to_ptr.vmem [resolvable:$true] %s176_s6 }
   0xd   : > { %s191_s9 = sshll.u32 %s1471_s3, 4  ;;  %s1272_s10 = smov 64   ;;  %s192_s9 = int_to_ptr.hbm [resolvable:$true] %s191_s9 }
   0xe   : > { %p1045_p9 = pneg %p1353_p8  ;;  %s1273_s11 = smov 4  }
   0xf   : > { %s1274_s12 = smov [#allocation9]   ;;  %s1366_s14 = sadd.s32 1, %s1269_s21  }
  0x10   : > { %p1046_p10 = pnand %p1045_p9, %p43_p1  ;;  %s193_s13 = sshll.u32 %s1274_s12, 4  ;;  %s194_s13 = int_to_ptr.vmem [resolvable:$true] %s193_s13 }
  0x11   : > { %s29_s15 = sadd.s32 1, %s1265_s20  ;;  %s26_s16 = ssub.s32 %s1269_s21, %s1366_s14 }
  0x12   : > { %1048 = dma.hbm_to_vmem [thread:$0]  (!%p1046_p10), %s175_s28, 1536, %s177_s6, [#allocation8], %s1272_s10, %s1272_s10, %s1273_s11  }
  0x13   : > { %1051 = dma.hbm_to_vmem [thread:$0]  (!%p1046_p10), %s192_s9, 3072, %s194_s13, [#allocation8], %s1272_s10, %s1272_s10, %s1273_s11  }
  0x14   : > { %p36_p12 = scmp.ne.s32.totalorder %s1265_s20, %s1261_s19  ;;  %p27_p13 = scmp.eq.s32.totalorder %s26_s16, 0 }
  0x15   : > { %p37_p0 = scmp.eq.s32.totalorder %s1269_s21, 0  ;;  %p1062_p5 = scmp.lt.s32.totalorder %s1269_s21, 2 }
  0x16   : > { %p1376_p3 = por %p150_p2, %p36_p12  ;;  %s210_s26 = sand.u32 1, %s1265_s20  }
  0x17   : > { %s1382_s23 = scalar_select %p27_p13, %s1265_s20, %s29_s15  }
  0x18   : > { %p38_p7 = por %p37_p0, %p36_p12  ;;  %s835_s27 = sshll.u32 %s210_s26, 4 }
  0x19   : > { %s995_s28 = sshll.u32 %s1269_s21, 4  ;;  %s214_s8 = scalar_lea.vmem [#allocation4], %s835_s27 }
  0x1a   : > { %s219_s7 = scalar_lea.hbm %s1468_s0, %s995_s28  ;;  %s222_s9 = sshll.u32 %s214_s8, 4  ;;  %s223_s9 = int_to_ptr.vmem [resolvable:$true] %s222_s9 }
  0x1b   : > { %s220_s10 = sshll.u32 %s219_s7, 4  ;;  %p1389_p2 = pnand %p1062_p5, %p38_p7  ;;  %s221_s10 = int_to_ptr.hbm [resolvable:$true] %s220_s10 }
  0x1c   : > { %s211_s12 = scalar_lea.sflag [#allocation5], %s210_s26  ;;  %s1169_s13 = sshra.s32 %s221_s10, 4  ;;  %s1170_s13 = int_to_ptr.hbm [resolvable:$true] %s1169_s13 }
  0x1d   : > { %s1171_s15 = scalar_lea.hbm %s1170_s13, 16  ;;  %p1173_p10 = pneg %p1389_p2 }
  0x1e   : > { %p1172_p9 = scmp.ne.s32.totalorder %s1170_s13, %s1171_s15  ;;  %s1176_s28 = scalar_lea.hbm %s1468_s0, 32 }
  0x1f   : > { %p1177_p0 = scmp.lt.s32.totalorder %s1170_s13, %s1468_s0  ;;  %p1178_p5 = scmp.lt.s32.totalorder %s1176_s28, %s1171_s15 }
  0x20   : > { %p1174_p12 = pnand %p1173_p10, %p1172_p9 }
  0x21   : > { %p1179_p7 = por %p1178_p5, %p1177_p0 }
  0x22   : > { %p1175_p13 = pneg %p1174_p12 }
  0x24   : > { %p1180_p11 = pnand %p1179_p7, %p1175_p13 }
  0x26   : > { %1183 = shalt.err (!%p1180_p11)
}
  0x27   : > { %s1275_s26 = smov 128   ;;  %s1276_s7 = smov 8  }
  0x28   : > { %1055 = dma.hbm_to_vmem [thread:$0]  (!%p1389_p2), %s221_s10, 256, %s223_s9, %s211_s12, %s1275_s26, %s1275_s26, %s1276_s7  }
  0x29   : > { %234 = sbr.rel (%p1353_p8) target bundleno = 389 (0x185), region = 40  ;;  %s1406_s8 = sand.u32 (!%p1353_p8), 1, %s1261_s19  }
  0x2a   : > { %s839_s13 = sshll.u32 (!%p1353_p8), %s1406_s8, 4  ;;  %s237_s15 = scalar_lea.sflag (!%p1353_p8), [#allocation5], %s1406_s8 }
  0x2b   : > { %s240_s16 = scalar_lea.vmem (!%p1353_p8), [#allocation4], %s839_s13 }
  0x2e   : > { %1244 = dma.done.wait (%p1340_p4), %s237_s15, 256  }
  0x2f   : > { %1246 = vsyncadd (%p1340_p4), %s237_s15, 4294967040 }
  0x30   : > { %1248 = dma.done.wait (%p43_p1), [#allocation8], 4608  }
  0x31   : > { %1250 = vsyncadd (%p43_p1), [#allocation8], 4294962688  ;;  %vm279_vm0 = vcmask 523264   ;;  %vm282_vm1 = vcmask 517120   ;;  %v1277_v0 = vmov 0.0   ;;  %v999_v1 = vld [vmem:[#allocation7 + $0x18] sm:$0xff] }
  0x32   : > { %280 = vst.msk [vmem:[#allocation2] sm:$0xff] %vm279_vm0, %v1277_v0  ;;  %v1003_v2 = vld [vmem:[#allocation7 + $0x38] sm:$0xff]  ;;  %334 = vmatpush.bf16.msra.mxu2 %v999_v1  ;;  %v998_v3 = vld [vmem:[#allocation7 + $0x10] sm:$0xff]  ;;  %v997_v7 = vld [vmem:[#allocation7 + $0x8] sm:$0xff]  ;;  %s1032_s11 = sshll.u32 %s1331_s22, 4  ;;  %s277_s30 = scalar_lea.vmem [#allocation10], %s839_s13 }
  0x33   : > { %281 = vst.msk [vmem:[#allocation2 + $0x8] sm:$0xff] %vm279_vm0, %v1277_v0  ;;  %v287_v4 = vld [vmem:[%s240_s16] sm:$0xff]  ;;  %v288_v5 = vld [vmem:[%s240_s16 + $0x8] sm:$0xff]  ;;  %392 = vmatpush.bf16.msra.mxu1 %v1003_v2  ;;  %s734_s28 = scalar_lea.hbm %s1473_s5, %s1032_s11  ;;  %s735_s6 = sshll.u32 %s277_s30, 4  ;;  %s736_s6 = int_to_ptr.vmem [resolvable:$true] %s735_s6 }
  0x34   : > { %283 = vst.msk [vmem:[#allocation2 + $0x10] sm:$0x3] %vm282_vm1, %v1277_v0  ;;  %v1002_v6 = vld [vmem:[#allocation7 + $0x30] sm:$0xff]  ;;  %v1001_v8 = vld [vmem:[#allocation7 + $0x28] sm:$0xff]  ;;  %v996_v9 = vld [vmem:[#allocation7] sm:$0xff]  ;;  %s737_s26 = sshll.u32 %s734_s28, 4  ;;  %s738_s26 = int_to_ptr.hbm [resolvable:$true] %s737_s26 }
  0x35   : > { %284 = vst [vmem:[#allocation3] sm:$0xff] %v1277_v0  ;;  %v1007_v11 = vld [vmem:[#allocation7 + $0x58] sm:$0xff]  ;;  %v1000_v12 = vld [vmem:[#allocation7 + $0x20] sm:$0xff]  ;;  %v1006_v18 = vld [vmem:[#allocation7 + $0x50] sm:$0xff]  ;;  %s723_s22 = scalar_lea.sflag [#allocation6], %s1406_s8  ;;  %s1213_s7 = sshra.s32 %s738_s26, 4  ;;  %s1214_s7 = int_to_ptr.hbm [resolvable:$true] %s1213_s7 }
  0x36   : > { %285 = vst [vmem:[#allocation3 + $0x8] sm:$0xff] %v1277_v0  ;;  %335 = vmatpush.bf16.msra.mxu2 %v998_v3  ;;  %v1005_v19 = vld [vmem:[#allocation7 + $0x48] sm:$0xff]  ;;  %v1004_v20 = vld [vmem:[#allocation7 + $0x40] sm:$0xff]  ;;  %v1023_v24 = vld [vmem:[#allocation9 + $0x78] sm:$0xff]  ;;  %s1215_s15 = scalar_lea.hbm %s1214_s7, 16  ;;  %s1219_s24 = scalar_lea.hbm %s1473_s5, 32 }
  0x37   : > { %286 = vst [vmem:[#allocation3 + $0x10] sm:$0x3] %v1277_v0  ;;  %393 = vmatpush.bf16.msra.mxu1 %v1002_v6  ;;  %618 = vmatpush.bf16.msra.mxu0 %v1023_v24  ;;  %v1022_v25 = vld [vmem:[#allocation9 + $0x70] sm:$0xff]  ;;  %v1015_v26 = vld [vmem:[#allocation9 + $0x38] sm:$0xff]  ;;  %v1021_v28 = vld [vmem:[#allocation9 + $0x68] sm:$0xff]  ;;  %p1216_p1 = scmp.ne.s32.totalorder %s1214_s7, %s1215_s15  ;;  %p1220_p11 = scmp.lt.s32.totalorder %s1214_s7, %s1473_s5 }
  0x38   : > { %289 = vst.msk [vmem:[#allocation2 + $0x1] sm:$0xff] %vm279_vm0, %v287_v4  ;;  %v1031_v27 = vld [vmem:[#allocation9 + $0xb8] sm:$0xff]  ;;  %531 = vmatpush.bf16.msra.mxu3 %v1015_v26  ;;  %v1014_v29 = vld [vmem:[#allocation9 + $0x30] sm:$0xff]  ;;  %v1020_v31 = vld [vmem:[#allocation9 + $0x60] sm:$0xff]  ;;  %p1221_p2 = scmp.lt.s32.totalorder %s1219_s24, %s1215_s15 }
  0x39   : > { %290 = vst.msk [vmem:[#allocation2 + $0x9] sm:$0xff] %vm279_vm0, %v288_v5  ;;  %v1030_v30 = vld [vmem:[#allocation9 + $0xb0] sm:$0xff]  ;;  %v1013_v32 = vld [vmem:[#allocation9 + $0x28] sm:$0xff]  ;;  %v1019_v34 = vld [vmem:[#allocation9 + $0x58] sm:$0xff]  ;;  %p1217_p4 = pnand %p1216_p1, %p1376_p3 }
  0x3a   : > { %336 = vmatpush.bf16.msra.mxu2 %v997_v7  ;;  %v1029_v33 = vld [vmem:[#allocation9 + $0xa8] sm:$0xff]  ;;  %v1012_v35 = vld [vmem:[#allocation9 + $0x20] sm:$0xff]  ;;  %v1018_v37 = vld [vmem:[#allocation9 + $0x50] sm:$0xff]  ;;  %p1222_p9 = por %p1221_p2, %p1220_p11 }
  0x3b   : > { %394 = vmatpush.bf16.msra.mxu1 %v1001_v8  ;;  %619 = vmatpush.bf16.msra.mxu0 %v1022_v25  ;;  %v1028_v36 = vld [vmem:[#allocation9 + $0xa0] sm:$0xff]  ;;  %v1011_v38 = vld [vmem:[#allocation9 + $0x18] sm:$0xff]  ;;  %v1017_v40 = vld [vmem:[#allocation9 + $0x48] sm:$0xff]  ;;  %p1218_p8 = pneg %p1217_p4 }
  0x3c   : > { %532 = vmatpush.bf16.msra.mxu3 %v1014_v29  ;;  %v1027_v39 = vld [vmem:[#allocation9 + $0x98] sm:$0xff]  ;;  %v1010_v41 = vld [vmem:[#allocation9 + $0x10] sm:$0xff]  ;;  %v1016_v43 = vld [vmem:[#allocation9 + $0x40] sm:$0xff] }
  0x3d   : > { %v1026_v42 = vld [vmem:[#allocation9 + $0x90] sm:$0xff]  ;;  %v1009_v44 = vld [vmem:[#allocation9 + $0x8] sm:$0xff]  ;;  %v1008_v47 = vld [vmem:[#allocation9] sm:$0xff]  ;;  %p1223_p10 = pnand %p1222_p9, %p1218_p8 }
  0x3e   : > { %337 = vmatpush.bf16.msra.mxu2 %v996_v9  ;;  %v1025_v45 = vld [vmem:[#allocation9 + $0x88] sm:$0xff]  ;;  %v1024_v48 = vld [vmem:[#allocation9 + $0x80] sm:$0xff]  ;;  %v1107_v49 = vld [vmem:[%s1470_s2] ss:$0 sm:$0xff] }
  0x3f   : > { %v292_v10 = vld [vmem:[#allocation2] sm:$0xff]  ;;  %395 = vmatpush.bf16.msra.mxu1 %v1000_v12  ;;  %620 = vmatpush.bf16.msra.mxu0 %v1021_v28 }
  0x40   : > { %v293_v13 = vld [vmem:[#allocation2 + $0x8] sm:$0xff]  ;;  %533 = vmatpush.bf16.msra.mxu3 %v1013_v32  ;;  %v1108_v6 = vld [vmem:[%s1472_s4] ss:$0 sm:$0xff] }
  0x41   : > { %v349_v14 = vld [vmem:[#allocation2 + $0x1] sm:$0xff]  ;;  %v350_v15 = vld [vmem:[#allocation2 + $0x9] sm:$0xff]  ;;  %v294_v16 = vpack.c.bf16 %v293_v13, %v292_v10 }
  0x42   : > { %v351_v17 = vpack.c.bf16 %v350_v15, %v349_v14  ;;  %447 = vmatpush.bf16.msrb.mxu2 %v1007_v11  ;;  %v404_v21 = vld [vmem:[#allocation2 + $0x2] sm:$0xff]  ;;  %v405_v22 = vld [vmem:[#allocation2 + $0xa] sm:$0xff] }
  0x43   : > { %859 = vmatmul.msk.bf16.vlgmr.msra.gmra.mxu2 %vm279_vm0, %v294_v16  ;;  %v406_v23 = vpack.c.bf16 %v405_v22, %v404_v21  ;;  %702 = vmatpush.bf16.msrb.mxu1 %v1031_v27 }
  0x44   : > { %876 = vmatmul.msk.bf16.vlgmr.msra.gmra.mxu1 %vm279_vm0, %v351_v17  ;;  %621 = vmatpush.bf16.msra.mxu0 %v1020_v31 }
  0x45   : > { %534 = vmatpush.bf16.msra.mxu3 %v1012_v35 }
  0x46   : > { %448 = vmatpush.bf16.msrb.mxu2 %v1006_v18 }
  0x47   : > { %703 = vmatpush.bf16.msrb.mxu1 %v1030_v30 }
  0x48   : > { %622 = vmatpush.bf16.msra.mxu0 %v1019_v34 }
  0x49   : > { %535 = vmatpush.bf16.msra.mxu3 %v1011_v38 }
  0x4a   : > { %449 = vmatpush.bf16.msrb.mxu2 %v1005_v19 }
  0x4b   : > { %704 = vmatpush.bf16.msrb.mxu1 %v1029_v33 }
  0x4c   : > { %623 = vmatpush.bf16.msra.mxu0 %v1018_v37 }
  0x4d   : > { %536 = vmatpush.bf16.msra.mxu3 %v1010_v41 }
  0x4e   : > { %450 = vmatpush.bf16.msrb.mxu2 %v1004_v20 }
  0x4f   : > { %705 = vmatpush.bf16.msrb.mxu1 %v1028_v36 }
  0x50   : > { %624 = vmatpush.bf16.msra.mxu0 %v1017_v40 }
  0x51   : > { %537 = vmatpush.bf16.msra.mxu3 %v1009_v44 }
  0x53   : > { %893 = vmatmul.msk.bf16.vlgmr.msrb.gmra.mxu2 %vm279_vm0, %v406_v23  ;;  %706 = vmatpush.bf16.msrb.mxu1 %v1027_v39 }
  0x54   : > { %625 = vmatpush.bf16.msra.mxu0 %v1016_v43 }
  0x55   : > { %538 = vmatpush.bf16.msra.mxu3 %v1008_v47 }
  0x57   : > { %707 = vmatpush.bf16.msrb.mxu1 %v1026_v42 }
  0x5b   : > { %708 = vmatpush.bf16.msrb.mxu1 %v1025_v45 }
  0x5f   : > { %709 = vmatpush.bf16.msrb.mxu1 %v1024_v48 }
  0xc1   : > { %v397_v51 = vpop.f32.mrf.mxu1 }
  0xc6   : > { %v339_v46 = vpop.f32.mrf.mxu2 }
  0xc7   : > { %v347_v52 = vadd.f32 %v1107_v49, %v339_v46 }
  0xc9   : > { %v402_v53 = vadd.f32 %v397_v51, %v347_v52  ;;  %v399_v58 = vpop.f32.mrf.mxu1 }
  0xce   : > { %v341_v50 = vpop.f32.mrf.mxu2 }
  0xcf   : > { %v348_v56 = vadd.f32 %v1107_v49, %v341_v50 }
  0xd1   : > { %v403_v59 = vadd.f32 %v399_v58, %v348_v56 }
  0xd6   : > { %v452_v54 = vpop.f32.mrf.mxu2 }
  0xd7   : > { %v457_v55 = vadd.f32 %v452_v54, %v402_v53 }
  0xd9   : > { %v459_v57 = vmax.f32 %v457_v55, 0.0 }
  0xdb   : > { %461 = vst [vmem:[#allocation3 + $0x1] sm:$0xff] %v459_v57 }
  0xde   : > { %v454_v60 = vpop.f32.mrf.mxu2 }
  0xdf   : > { %v458_v61 = vadd.f32 %v454_v60, %v403_v59 }
  0xe1   : > { %v460_v62 = vmax.f32 %v458_v61, 0.0 }
  0xe2   : > { %v464_v0 = vld [vmem:[#allocation3] sm:$0xff] }
  0xe3   : > { %462 = vst [vmem:[#allocation3 + $0x9] sm:$0xff] %v460_v62  ;;  %v552_v63 = vpack.c.bf16 %v460_v62, %v459_v57 }
  0xe5   : > { %626 = vmatmul.bf16.vlgmr.msra.gmra.mxu0 %v552_v63 }
  0xea   : > { %v465_v1 = vld [vmem:[#allocation3 + $0x8] sm:$0xff] }
  0xeb   : > { %v634_v2 = vld [vmem:[#allocation3 + $0x2] sm:$0xff]  ;;  %v635_v3 = vld [vmem:[#allocation3 + $0xa] sm:$0xff]  ;;  %v466_v4 = vpack.c.bf16 %v465_v1, %v464_v0 }
  0xec   : > { %v636_v5 = vpack.c.bf16 %v635_v3, %v634_v2 }
  0xed   : > { %539 = vmatmul.bf16.vlgmr.msra.gmra.mxu3 %v466_v4 }
  0xee   : > { %710 = vmatmul.bf16.vlgmr.msrb.gmra.mxu1 %v636_v5 }
 0x162   : > { %v627_v7 = vpop.f32.mrf.mxu0 }
 0x16a   : > { %v629_v16 = vpop.f32.mrf.mxu0 }
 0x16b   : > { %v711_v10 = vpop.f32.mrf.mxu1 }
 0x170   : > { %v540_v8 = vpop.f32.mrf.mxu3 }
 0x171   : > { %v548_v9 = vadd.f32 %v1108_v6, %v540_v8 }
 0x173   : > { %v632_v11 = vadd.f32 %v627_v7, %v548_v9  ;;  %v713_v18 = vpop.f32.mrf.mxu1 }
 0x175   : > { %v716_v12 = vadd.f32 %v711_v10, %v632_v11 }
 0x177   : > { %v718_v13 = vmax.f32 %v716_v12, 0.0 }
 0x178   : > { %v542_v14 = vpop.f32.mrf.mxu3 }
 0x179   : > { %720 = vst [vmem:[%s277_s30] sm:$0xff] %v718_v13  ;;  %v549_v15 = vadd.f32 %v1108_v6, %v542_v14 }
 0x17b   : > { %v633_v17 = vadd.f32 %v629_v16, %v549_v15 }
 0x17d   : > { %v717_v19 = vadd.f32 %v713_v18, %v633_v17 }
 0x17f   : > { %v719_v20 = vmax.f32 %v717_v19, 0.0 }
 0x181   : > { %721 = vst [vmem:[%s277_s30 + $0x8] sm:$0xff] %v719_v20 }
 0x182   : > { %1226 = shalt.err (!%p1223_p10)
}
 0x183   : > { %s1278_s8 = smov 128   ;;  %s1279_s10 = smov 8  }
 0x184   : > { %1043 = dma.vmem_to_hbm [thread:$0]  (%p1376_p3), %s736_s6, 256, %s738_s26, %s723_s22, %s1278_s8, %s1278_s8, %s1279_s10  }
 0x185 PF: > { %s752_s11 = sand.u32 1, %s1257_s18   ;;  %p1479_p12 = scmp.ge.s32.totalorder %s1269_s21, 2 }
 0x186   : > { %s753_s12 = scalar_lea.sflag [#allocation6], %s752_s11 }
 0x187   : > { %p1057_p13 = pnand %p1479_p12, %p1345_p6 }
 0x189   : > { %p1058_p0 = pneg %p1057_p13 }
 0x18b   : > { %1252 = dma.done.wait (%p1058_p0), %s753_s12, 256  }
 0x18c   : > { %1254 = vsyncadd (%p1058_p0), %s753_s12, 4294967040  ;;  %p19_p5 = scmp.ge.s32.totalorder %s1366_s14, 4   ;;  %s1480_s18 = smov %s1261_s19 }
 0x18d   : > { %s1481_s19 = smov %s1265_s20  ;;  %s1482_s20 = smov %s1382_s23 }
 0x18e   : > { %s1483_s21 = smov %s1366_s14  ;;  %21 = sbr.rel (!%p19_p5) target bundleno = 6 (0x6), region = 97 }
 0x193   :  { %759 = vsyncpa [#allocation5], 1 }
 0x194   :  { %761 = vsyncpa [#allocation5 + $0x1], 1 }
 0x195   :  { %762 = vsyncpa [#allocation8], 1 }
 0x196   :  { %763 = vsyncpa [#allocation6], 1 }
 0x197   :  { %765 = vsyncpa [#allocation6 + $0x1], 1 }

</bundles_post_ra>
